<compile_context>
chip_gen: v6e
topology: v6e:2x2x1
jax: 0.10.0
libtpu: 0.0.40
codegen_flags: <defaults>
</compile_context>

<pallas_src>
import jax
import jax.numpy as jnp
from jax import lax
from jax.experimental import pallas as pl
from jax.experimental.pallas import tpu as pltpu

# Layer plan of Conv1DThreeChannel: 3 -> 16 -> 32 -> 16 -> 3, k=3, padding=1.
LAYER_DIMS = ((3, 16), (16, 32), (32, 16), (16, 3))
RELUS = (True, True, True, False)
K = 3          # conv taps
CMAX = 32      # max channel count -> packed weight tile edge
LANE = 128     # TPU lane width


# ----------------------------------------------------------------------------
# Fused kernel: NB batch samples per grid step, all 4 layers in one body.
#   x_ref : (NB, 3, L_pad)       channels on sublanes, L on lanes
#   w_ref : (12, 32, 32)         w_ref[3*layer + tap, :cout, :cin]
#   b_ref : (4, 32, 1)           b_ref[layer, :cout, :]
#   o_ref : (NB, 3, L_pad)
# ----------------------------------------------------------------------------
def _make_kernel(l_valid, l_pad):
    def kernel(x_ref, w_ref, b_ref, o_ref):
        nb = x_ref.shape[0]

        # Lane masks implementing Conv1d padding=1 at the *true* sequence
        # boundaries.  Columns >= l_valid are wrapper padding; garbage there
        # never leaks left because the "next" tap is masked at l_valid-1.
        lane = lax.broadcasted_iota(jnp.int32, (1, l_pad), 1)
        keep_prev = lane >= 1                 # zero shifted-in left column
        keep_next = lane < (l_valid - 1)      # zero shifted-in right column

        def conv_layer(h, li, cin, cout, relu):
            # Three accumulated matmuls (one per tap) instead of an im2col
            # concat: shifts on the XLU, boundary zeros on the VPU, nothing
            # stored/reloaded through VMEM.
            w0 = w_ref[K * li + 0, :cout, :cin]     # tap for x[l-1]
            w1 = w_ref[K * li + 1, :cout, :cin]     # tap for x[l]
            w2 = w_ref[K * li + 2, :cout, :cin]     # tap for x[l+1]
            b = b_ref[li, :cout, :]                 # (cout, 1)

            prev = jnp.where(keep_prev, pltpu.roll(h, 1, axis=1), 0.0)
            nxt = jnp.where(keep_next, pltpu.roll(h, l_pad - 1, axis=1), 0.0)

            y = jnp.dot(w1, h, preferred_element_type=jnp.float32)
            y = y + jnp.dot(w0, prev, preferred_element_type=jnp.float32)
            y = y + jnp.dot(w2, nxt, preferred_element_type=jnp.float32)
            y = y + b
            return jnp.maximum(y, 0.0) if relu else y

        def one_sample(n, carry):
            h = x_ref[n].astype(jnp.float32)        # (3, L_pad)
            for li, (cin, cout) in enumerate(LAYER_DIMS):
                h = conv_layer(h, li, cin, cout, RELUS[li])
            o_ref[n] = h.astype(o_ref.dtype)
            return carry

        # Unrolled so the LLO scheduler sees the whole batch block.
        lax.fori_loop(0, nb, one_sample, 0, unroll=True)

    return kernel


# ----------------------------------------------------------------------------
# Wrapper: batch-blocked grid, lane-dense L, weights resident across steps.
# ----------------------------------------------------------------------------
def conv1d_three_channel_forward(x_ncl, w_packed, b_packed):
    n, c, l = x_ncl.shape
    assert c == LAYER_DIMS[0][0]

    # Lane-dense sequence axis (biggest measured lever for vld/vst).
    l_pad = max(LANE, ((l + LANE - 1) // LANE) * LANE)

    # Batch block size: amortize per-step overhead, keep >= 2 grid steps for
    # megacore / v7x's 2 TCs, cap the per-step footprint.
    nb = min(8, max(1, -(-n // 2)))
    while nb > 1 and nb * l_pad > (1 << 18):
        nb //= 2
    n_pad = -(-n // nb) * nb

    xp = x_ncl
    if n_pad != n or l_pad != l:
        xp = jnp.pad(x_ncl, ((0, n_pad - n), (0, 0), (0, l_pad - l)))

    c_out = LAYER_DIMS[-1][1]
    kernel = _make_kernel(l, l_pad)

    out = pl.pallas_call(
        kernel,
        out_shape=jax.ShapeDtypeStruct((n_pad, c_out, l_pad), x_ncl.dtype),
        grid=(n_pad // nb,),
        in_specs=[
            pl.BlockSpec((nb, c, l_pad), lambda i: (i, 0, 0)),
            pl.BlockSpec(w_packed.shape, lambda i: (0, 0, 0)),   # resident
            pl.BlockSpec(b_packed.shape, lambda i: (0, 0, 0)),   # resident
        ],
        out_specs=pl.BlockSpec((nb, c_out, l_pad), lambda i: (i, 0, 0)),
        compiler_params=pltpu.CompilerParams(
            dimension_semantics=("parallel",),
            vmem_limit_bytes=32 * 1024 * 1024,
        ),
    )(xp, w_packed, b_packed)

    if n_pad != n or l_pad != l:
        out = out[:n, :, :l]
    return out


# ----------------------------------------------------------------------------
# Parameters (deterministic PyTorch-style uniform init for Conv1d).
# PyTorch weight layout: (Cout, Cin, K).  Kernel layout: one packed slab
# w_packed[3*layer + k, :cout, :cin] = w[layer][:, :, k]  (zero elsewhere).
# ----------------------------------------------------------------------------
def init_conv_params(key, cin, cout, k=K):
    kw, kb = jax.random.split(key)
    bound = 1.0 / jnp.sqrt(cin * k)
    w = jax.random.uniform(kw, (cout, cin, k), jnp.float32, -bound, bound)
    b = jax.random.uniform(kb, (cout,), jnp.float32, -bound, bound)
    return w, b


def make_params(key):
    keys = jax.random.split(key, len(LAYER_DIMS))
    return [init_conv_params(kk, ci, co) for kk, (ci, co) in zip(keys, LAYER_DIMS)]


def pack_params(layer_params):
    w_packed = jnp.zeros((K * len(layer_params), CMAX, CMAX), jnp.float32)
    b_packed = jnp.zeros((len(layer_params), CMAX, 1), jnp.float32)
    for li, (w, b) in enumerate(layer_params):
        cout, cin, _ = w.shape
        for k in range(K):
            w_packed = w_packed.at[K * li + k, :cout, :cin].set(w[:, :, k])
        b_packed = b_packed.at[li, :cout, 0].set(b)
    return w_packed, b_packed


# ----------------------------------------------------------------------------
# Pure-JAX reference for the correctness check.
# ----------------------------------------------------------------------------
def reference_forward(x_ncl, layer_params):
    x = x_ncl
    for (w, b), relu in zip(layer_params, RELUS):
        x = lax.conv_general_dilated(
            x, w, window_strides=(1,), padding=((1, 1),),
            dimension_numbers=("NCH", "OIH", "NCH"))
        x = x + b[None, :, None]
        if relu:
            x = jnp.maximum(x, 0.0)
    return x


if __name__ == "__main__":
    key = jax.random.PRNGKey(0)
    k_param, k_x1, k_x2 = jax.random.split(key, 3)
    layer_params = make_params(k_param)
    w_packed, b_packed = pack_params(layer_params)

    # Small shape consistent with the module: batch=2, channels=3, length=16.
    x = jax.random.normal(k_x1, (2, 3, 16), jnp.float32)
    out = jax.block_until_ready(conv1d_three_channel_forward(x, w_packed, b_packed))
    ref = jax.block_until_ready(reference_forward(x, layer_params))
    assert out.shape == ref.shape == (2, 3, 16)
    assert jnp.allclose(out, ref, atol=1e-4, rtol=1e-4), "mismatch vs reference"

    # Lane-dense shape (L multiple of 128) exercising batch blocking (NB=2).
    x2 = jax.random.normal(k_x2, (4, 3, 128), jnp.float32)
    out2 = jax.block_until_ready(conv1d_three_channel_forward(x2, w_packed, b_packed))
    ref2 = jax.block_until_ready(reference_forward(x2, layer_params))
    assert jnp.allclose(out2, ref2, atol=1e-4, rtol=1e-4), "mismatch vs reference"

    print("KERNEL_OK")
</pallas_src>

<mosaic_0001>
module attributes {stable_mosaic.version = 11 : i64} {
  func.func @kernel(%arg0: i32, %arg1: memref<1x3x128xf32, #tpu.memory_space<vmem>>, %arg2: memref<12x32x32xf32, #tpu.memory_space<vmem>>, %arg3: memref<4x32x1xf32, #tpu.memory_space<vmem>>, %arg4: memref<1x3x128xf32, #tpu.memory_space<vmem>>) attributes {dimension_semantics = [#tpu.dimension_semantics<parallel>], iteration_bounds = array<i64: 2>, scalar_prefetch = 0 : i64, scratch_operands = 0 : i64, tpu.core_type = #tpu.core_type<tc>, window_params = [{transform_indices = @transform_0, window_bounds = array<i64: 1, 3, 128>}, {pipeline_mode = #tpu.pipeline_mode<synchronous>, transform_indices = @transform_1, window_bounds = array<i64: 12, 32, 32>}, {pipeline_mode = #tpu.pipeline_mode<synchronous>, transform_indices = @transform_2, window_bounds = array<i64: 4, 32, 1>}, {transform_indices = @transform_3, window_bounds = array<i64: 1, 3, 128>}]} {
    %0 = tpu.iota {dimensions = array<i32: 1>} : vector<1x128xi32>
    %c1_i32 = arith.constant 1 : i32
    %1 = vector.broadcast %c1_i32 : i32 to vector<1x128xi32>
    %2 = arith.cmpi sge, %0, %1 : vector<1x128xi32>
    %c15_i32 = arith.constant 15 : i32
    %3 = vector.broadcast %c15_i32 : i32 to vector<1x128xi32>
    %4 = arith.cmpi slt, %0, %3 : vector<1x128xi32>
    %c0_i32 = arith.constant 0 : i32
    %5 = arith.index_cast %c0_i32 : i32 to index
    %c0 = arith.constant 0 : index
    %c0_0 = arith.constant 0 : index
    %6 = vector.load %arg1[%5, %c0, %c0_0] : memref<1x3x128xf32, #tpu.memory_space<vmem>>, vector<1x3x128xf32>
    %7 = vector.shape_cast %6 : vector<1x3x128xf32> to vector<3x128xf32>
    %c0_1 = arith.constant 0 : index
    %c0_2 = arith.constant 0 : index
    %c0_3 = arith.constant 0 : index
    %8 = vector.load %arg2[%c0_1, %c0_2, %c0_3] : memref<12x32x32xf32, #tpu.memory_space<vmem>>, vector<1x16x3xf32>
    %9 = vector.shape_cast %8 : vector<1x16x3xf32> to vector<16x3xf32>
    %c1 = arith.constant 1 : index
    %c0_4 = arith.constant 0 : index
    %c0_5 = arith.constant 0 : index
    %10 = vector.load %arg2[%c1, %c0_4, %c0_5] : memref<12x32x32xf32, #tpu.memory_space<vmem>>, vector<1x16x3xf32>
    %11 = vector.shape_cast %10 : vector<1x16x3xf32> to vector<16x3xf32>
    %c2 = arith.constant 2 : index
    %c0_6 = arith.constant 0 : index
    %c0_7 = arith.constant 0 : index
    %12 = vector.load %arg2[%c2, %c0_6, %c0_7] : memref<12x32x32xf32, #tpu.memory_space<vmem>>, vector<1x16x3xf32>
    %13 = vector.shape_cast %12 : vector<1x16x3xf32> to vector<16x3xf32>
    %c0_8 = arith.constant 0 : index
    %c0_9 = arith.constant 0 : index
    %c0_10 = arith.constant 0 : index
    %14 = vector.load %arg3[%c0_8, %c0_9, %c0_10] : memref<4x32x1xf32, #tpu.memory_space<vmem>>, vector<1x16x1xf32>
    %15 = vector.shape_cast %14 : vector<1x16x1xf32> to vector<16x1xf32>
    %c1_i32_11 = arith.constant 1 : i32
    %16 = tpu.dynamic_rotate %7 by %c1_i32_11 dim 1 : vector<3x128xf32>, i32 -> vector<3x128xf32>
    %cst = arith.constant 0.000000e+00 : f32
    %17 = vector.shape_cast %2 : vector<1x128xi1> to vector<1x128xi1>
    %18 = vector.broadcast %17 : vector<1x128xi1> to vector<3x128xi1>
    %19 = vector.broadcast %cst : f32 to vector<3x128xf32>
    %20 = arith.select %18, %16, %19 : vector<3x128xi1>, vector<3x128xf32>
    %c127_i32 = arith.constant 127 : i32
    %21 = tpu.dynamic_rotate %7 by %c127_i32 dim 1 : vector<3x128xf32>, i32 -> vector<3x128xf32>
    %cst_12 = arith.constant 0.000000e+00 : f32
    %22 = vector.shape_cast %4 : vector<1x128xi1> to vector<1x128xi1>
    %23 = vector.broadcast %22 : vector<1x128xi1> to vector<3x128xi1>
    %24 = vector.broadcast %cst_12 : f32 to vector<3x128xf32>
    %25 = arith.select %23, %21, %24 : vector<3x128xi1>, vector<3x128xf32>
    %cst_13 = arith.constant dense<0.000000e+00> : vector<16x128xf32>
    %26 = tpu.matmul %11, %7, %cst_13 {dimension_numbers = #tpu.dot_dimension_numbers<[1], [0], [0], [1], [0, 0, 1, 1], [], []>} : vector<16x3xf32>, vector<3x128xf32>, vector<16x128xf32> -> vector<16x128xf32>
    %cst_14 = arith.constant dense<0.000000e+00> : vector<16x128xf32>
    %27 = tpu.matmul %9, %20, %cst_14 {dimension_numbers = #tpu.dot_dimension_numbers<[1], [0], [0], [1], [0, 0, 1, 1], [], []>} : vector<16x3xf32>, vector<3x128xf32>, vector<16x128xf32> -> vector<16x128xf32>
    %28 = arith.addf %26, %27 : vector<16x128xf32>
    %cst_15 = arith.constant dense<0.000000e+00> : vector<16x128xf32>
    %29 = tpu.matmul %13, %25, %cst_15 {dimension_numbers = #tpu.dot_dimension_numbers<[1], [0], [0], [1], [0, 0, 1, 1], [], []>} : vector<16x3xf32>, vector<3x128xf32>, vector<16x128xf32> -> vector<16x128xf32>
    %30 = arith.addf %28, %29 : vector<16x128xf32>
    %31 = vector.broadcast %15 : vector<16x1xf32> to vector<16x128xf32>
    %32 = arith.addf %30, %31 : vector<16x128xf32>
    %cst_16 = arith.constant 0.000000e+00 : f32
    %33 = vector.broadcast %cst_16 : f32 to vector<16x128xf32>
    %34 = arith.maximumf %32, %33 : vector<16x128xf32>
    %c3 = arith.constant 3 : index
    %c0_17 = arith.constant 0 : index
    %c0_18 = arith.constant 0 : index
    %35 = vector.load %arg2[%c3, %c0_17, %c0_18] : memref<12x32x32xf32, #tpu.memory_space<vmem>>, vector<1x32x16xf32>
    %36 = vector.shape_cast %35 : vector<1x32x16xf32> to vector<32x16xf32>
    %c4 = arith.constant 4 : index
    %c0_19 = arith.constant 0 : index
    %c0_20 = arith.constant 0 : index
    %37 = vector.load %arg2[%c4, %c0_19, %c0_20] : memref<12x32x32xf32, #tpu.memory_space<vmem>>, vector<1x32x16xf32>
    %38 = vector.shape_cast %37 : vector<1x32x16xf32> to vector<32x16xf32>
    %c5 = arith.constant 5 : index
    %c0_21 = arith.constant 0 : index
    %c0_22 = arith.constant 0 : index
    %39 = vector.load %arg2[%c5, %c0_21, %c0_22] : memref<12x32x32xf32, #tpu.memory_space<vmem>>, vector<1x32x16xf32>
    %40 = vector.shape_cast %39 : vector<1x32x16xf32> to vector<32x16xf32>
    %c1_23 = arith.constant 1 : index
    %c0_24 = arith.constant 0 : index
    %c0_25 = arith.constant 0 : index
    %41 = vector.load %arg3[%c1_23, %c0_24, %c0_25] : memref<4x32x1xf32, #tpu.memory_space<vmem>>, vector<1x32x1xf32>
    %42 = vector.shape_cast %41 : vector<1x32x1xf32> to vector<32x1xf32>
    %c1_i32_26 = arith.constant 1 : i32
    %43 = tpu.dynamic_rotate %34 by %c1_i32_26 dim 1 : vector<16x128xf32>, i32 -> vector<16x128xf32>
    %cst_27 = arith.constant 0.000000e+00 : f32
    %44 = vector.shape_cast %2 : vector<1x128xi1> to vector<1x128xi1>
    %45 = vector.broadcast %44 : vector<1x128xi1> to vector<16x128xi1>
    %46 = vector.broadcast %cst_27 : f32 to vector<16x128xf32>
    %47 = arith.select %45, %43, %46 : vector<16x128xi1>, vector<16x128xf32>
    %c127_i32_28 = arith.constant 127 : i32
    %48 = tpu.dynamic_rotate %34 by %c127_i32_28 dim 1 : vector<16x128xf32>, i32 -> vector<16x128xf32>
    %cst_29 = arith.constant 0.000000e+00 : f32
    %49 = vector.shape_cast %4 : vector<1x128xi1> to vector<1x128xi1>
    %50 = vector.broadcast %49 : vector<1x128xi1> to vector<16x128xi1>
    %51 = vector.broadcast %cst_29 : f32 to vector<16x128xf32>
    %52 = arith.select %50, %48, %51 : vector<16x128xi1>, vector<16x128xf32>
    %cst_30 = arith.constant dense<0.000000e+00> : vector<32x128xf32>
    %53 = tpu.matmul %38, %34, %cst_30 {dimension_numbers = #tpu.dot_dimension_numbers<[1], [0], [0], [1], [0, 0, 1, 1], [], []>} : vector<32x16xf32>, vector<16x128xf32>, vector<32x128xf32> -> vector<32x128xf32>
    %cst_31 = arith.constant dense<0.000000e+00> : vector<32x128xf32>
    %54 = tpu.matmul %36, %47, %cst_31 {dimension_numbers = #tpu.dot_dimension_numbers<[1], [0], [0], [1], [0, 0, 1, 1], [], []>} : vector<32x16xf32>, vector<16x128xf32>, vector<32x128xf32> -> vector<32x128xf32>
    %55 = arith.addf %53, %54 : vector<32x128xf32>
    %cst_32 = arith.constant dense<0.000000e+00> : vector<32x128xf32>
    %56 = tpu.matmul %40, %52, %cst_32 {dimension_numbers = #tpu.dot_dimension_numbers<[1], [0], [0], [1], [0, 0, 1, 1], [], []>} : vector<32x16xf32>, vector<16x128xf32>, vector<32x128xf32> -> vector<32x128xf32>
    %57 = arith.addf %55, %56 : vector<32x128xf32>
    %58 = vector.broadcast %42 : vector<32x1xf32> to vector<32x128xf32>
    %59 = arith.addf %57, %58 : vector<32x128xf32>
    %cst_33 = arith.constant 0.000000e+00 : f32
    %60 = vector.broadcast %cst_33 : f32 to vector<32x128xf32>
    %61 = arith.maximumf %59, %60 : vector<32x128xf32>
    %c6 = arith.constant 6 : index
    %c0_34 = arith.constant 0 : index
    %c0_35 = arith.constant 0 : index
    %62 = vector.load %arg2[%c6, %c0_34, %c0_35] : memref<12x32x32xf32, #tpu.memory_space<vmem>>, vector<1x16x32xf32>
    %63 = vector.shape_cast %62 : vector<1x16x32xf32> to vector<16x32xf32>
    %c7 = arith.constant 7 : index
    %c0_36 = arith.constant 0 : index
    %c0_37 = arith.constant 0 : index
    %64 = vector.load %arg2[%c7, %c0_36, %c0_37] : memref<12x32x32xf32, #tpu.memory_space<vmem>>, vector<1x16x32xf32>
    %65 = vector.shape_cast %64 : vector<1x16x32xf32> to vector<16x32xf32>
    %c8 = arith.constant 8 : index
    %c0_38 = arith.constant 0 : index
    %c0_39 = arith.constant 0 : index
    %66 = vector.load %arg2[%c8, %c0_38, %c0_39] : memref<12x32x32xf32, #tpu.memory_space<vmem>>, vector<1x16x32xf32>
    %67 = vector.shape_cast %66 : vector<1x16x32xf32> to vector<16x32xf32>
    %c2_40 = arith.constant 2 : index
    %c0_41 = arith.constant 0 : index
    %c0_42 = arith.constant 0 : index
    %68 = vector.load %arg3[%c2_40, %c0_41, %c0_42] : memref<4x32x1xf32, #tpu.memory_space<vmem>>, vector<1x16x1xf32>
    %69 = vector.shape_cast %68 : vector<1x16x1xf32> to vector<16x1xf32>
    %c1_i32_43 = arith.constant 1 : i32
    %70 = tpu.dynamic_rotate %61 by %c1_i32_43 dim 1 : vector<32x128xf32>, i32 -> vector<32x128xf32>
    %cst_44 = arith.constant 0.000000e+00 : f32
    %71 = vector.shape_cast %2 : vector<1x128xi1> to vector<1x128xi1>
    %72 = vector.broadcast %71 : vector<1x128xi1> to vector<32x128xi1>
    %73 = vector.broadcast %cst_44 : f32 to vector<32x128xf32>
    %74 = arith.select %72, %70, %73 : vector<32x128xi1>, vector<32x128xf32>
    %c127_i32_45 = arith.constant 127 : i32
    %75 = tpu.dynamic_rotate %61 by %c127_i32_45 dim 1 : vector<32x128xf32>, i32 -> vector<32x128xf32>
    %cst_46 = arith.constant 0.000000e+00 : f32
    %76 = vector.shape_cast %4 : vector<1x128xi1> to vector<1x128xi1>
    %77 = vector.broadcast %76 : vector<1x128xi1> to vector<32x128xi1>
    %78 = vector.broadcast %cst_46 : f32 to vector<32x128xf32>
    %79 = arith.select %77, %75, %78 : vector<32x128xi1>, vector<32x128xf32>
    %cst_47 = arith.constant dense<0.000000e+00> : vector<16x128xf32>
    %80 = tpu.matmul %65, %61, %cst_47 {dimension_numbers = #tpu.dot_dimension_numbers<[1], [0], [0], [1], [0, 0, 1, 1], [], []>} : vector<16x32xf32>, vector<32x128xf32>, vector<16x128xf32> -> vector<16x128xf32>
    %cst_48 = arith.constant dense<0.000000e+00> : vector<16x128xf32>
    %81 = tpu.matmul %63, %74, %cst_48 {dimension_numbers = #tpu.dot_dimension_numbers<[1], [0], [0], [1], [0, 0, 1, 1], [], []>} : vector<16x32xf32>, vector<32x128xf32>, vector<16x128xf32> -> vector<16x128xf32>
    %82 = arith.addf %80, %81 : vector<16x128xf32>
    %cst_49 = arith.constant dense<0.000000e+00> : vector<16x128xf32>
    %83 = tpu.matmul %67, %79, %cst_49 {dimension_numbers = #tpu.dot_dimension_numbers<[1], [0], [0], [1], [0, 0, 1, 1], [], []>} : vector<16x32xf32>, vector<32x128xf32>, vector<16x128xf32> -> vector<16x128xf32>
    %84 = arith.addf %82, %83 : vector<16x128xf32>
    %85 = vector.broadcast %69 : vector<16x1xf32> to vector<16x128xf32>
    %86 = arith.addf %84, %85 : vector<16x128xf32>
    %cst_50 = arith.constant 0.000000e+00 : f32
    %87 = vector.broadcast %cst_50 : f32 to vector<16x128xf32>
    %88 = arith.maximumf %86, %87 : vector<16x128xf32>
    %c9 = arith.constant 9 : index
    %c0_51 = arith.constant 0 : index
    %c0_52 = arith.constant 0 : index
    %89 = vector.load %arg2[%c9, %c0_51, %c0_52] : memref<12x32x32xf32, #tpu.memory_space<vmem>>, vector<1x3x16xf32>
    %90 = vector.shape_cast %89 : vector<1x3x16xf32> to vector<3x16xf32>
    %c10 = arith.constant 10 : index
    %c0_53 = arith.constant 0 : index
    %c0_54 = arith.constant 0 : index
    %91 = vector.load %arg2[%c10, %c0_53, %c0_54] : memref<12x32x32xf32, #tpu.memory_space<vmem>>, vector<1x3x16xf32>
    %92 = vector.shape_cast %91 : vector<1x3x16xf32> to vector<3x16xf32>
    %c11 = arith.constant 11 : index
    %c0_55 = arith.constant 0 : index
    %c0_56 = arith.constant 0 : index
    %93 = vector.load %arg2[%c11, %c0_55, %c0_56] : memref<12x32x32xf32, #tpu.memory_space<vmem>>, vector<1x3x16xf32>
    %94 = vector.shape_cast %93 : vector<1x3x16xf32> to vector<3x16xf32>
    %c3_57 = arith.constant 3 : index
    %c0_58 = arith.constant 0 : index
    %c0_59 = arith.constant 0 : index
    %95 = vector.load %arg3[%c3_57, %c0_58, %c0_59] : memref<4x32x1xf32, #tpu.memory_space<vmem>>, vector<1x3x1xf32>
    %96 = vector.shape_cast %95 : vector<1x3x1xf32> to vector<3x1xf32>
    %c1_i32_60 = arith.constant 1 : i32
    %97 = tpu.dynamic_rotate %88 by %c1_i32_60 dim 1 : vector<16x128xf32>, i32 -> vector<16x128xf32>
    %cst_61 = arith.constant 0.000000e+00 : f32
    %98 = vector.shape_cast %2 : vector<1x128xi1> to vector<1x128xi1>
    %99 = vector.broadcast %98 : vector<1x128xi1> to vector<16x128xi1>
    %100 = vector.broadcast %cst_61 : f32 to vector<16x128xf32>
    %101 = arith.select %99, %97, %100 : vector<16x128xi1>, vector<16x128xf32>
    %c127_i32_62 = arith.constant 127 : i32
    %102 = tpu.dynamic_rotate %88 by %c127_i32_62 dim 1 : vector<16x128xf32>, i32 -> vector<16x128xf32>
    %cst_63 = arith.constant 0.000000e+00 : f32
    %103 = vector.shape_cast %4 : vector<1x128xi1> to vector<1x128xi1>
    %104 = vector.broadcast %103 : vector<1x128xi1> to vector<16x128xi1>
    %105 = vector.broadcast %cst_63 : f32 to vector<16x128xf32>
    %106 = arith.select %104, %102, %105 : vector<16x128xi1>, vector<16x128xf32>
    %cst_64 = arith.constant dense<0.000000e+00> : vector<3x128xf32>
    %107 = tpu.matmul %92, %88, %cst_64 {dimension_numbers = #tpu.dot_dimension_numbers<[1], [0], [0], [1], [0, 0, 1, 1], [], []>} : vector<3x16xf32>, vector<16x128xf32>, vector<3x128xf32> -> vector<3x128xf32>
    %cst_65 = arith.constant dense<0.000000e+00> : vector<3x128xf32>
    %108 = tpu.matmul %90, %101, %cst_65 {dimension_numbers = #tpu.dot_dimension_numbers<[1], [0], [0], [1], [0, 0, 1, 1], [], []>} : vector<3x16xf32>, vector<16x128xf32>, vector<3x128xf32> -> vector<3x128xf32>
    %109 = arith.addf %107, %108 : vector<3x128xf32>
    %cst_66 = arith.constant dense<0.000000e+00> : vector<3x128xf32>
    %110 = tpu.matmul %94, %106, %cst_66 {dimension_numbers = #tpu.dot_dimension_numbers<[1], [0], [0], [1], [0, 0, 1, 1], [], []>} : vector<3x16xf32>, vector<16x128xf32>, vector<3x128xf32> -> vector<3x128xf32>
    %111 = arith.addf %109, %110 : vector<3x128xf32>
    %112 = vector.broadcast %96 : vector<3x1xf32> to vector<3x128xf32>
    %113 = arith.addf %111, %112 : vector<3x128xf32>
    %114 = arith.index_cast %c0_i32 : i32 to index
    %c0_67 = arith.constant 0 : index
    %c0_68 = arith.constant 0 : index
    %115 = vector.load %arg4[%114, %c0_67, %c0_68] : memref<1x3x128xf32, #tpu.memory_space<vmem>>, vector<1x3x128xf32>
    %116 = vector.shape_cast %115 : vector<1x3x128xf32> to vector<3x128xf32>
    %117 = vector.shape_cast %113 : vector<3x128xf32> to vector<1x3x128xf32>
    tpu.vector_store %arg4[%114, %c0_67, %c0_68], %117 {strides = array<i32>} : memref<1x3x128xf32, #tpu.memory_space<vmem>>, vector<1x3x128xf32>,
    %c1_i32_69 = arith.constant 1 : i32
    return
  }
  func.func @transform_0(%arg0: i32) -> (i32, i32, i32) {
    %c0_i32 = arith.constant 0 : i32
    %c0_i32_0 = arith.constant 0 : i32
    %c0_i32_1 = arith.constant 0 : i32
    return %arg0, %c0_i32, %c0_i32_0 : i32, i32, i32
  }
  func.func @transform_1(%arg0: i32) -> (i32, i32, i32) {
    %c0_i32 = arith.constant 0 : i32
    %c0_i32_0 = arith.constant 0 : i32
    %c0_i32_1 = arith.constant 0 : i32
    %c0_i32_2 = arith.constant 0 : i32
    return %c0_i32, %c0_i32_0, %c0_i32_1 : i32, i32, i32
  }
  func.func @transform_2(%arg0: i32) -> (i32, i32, i32) {
    %c0_i32 = arith.constant 0 : i32
    %c0_i32_0 = arith.constant 0 : i32
    %c0_i32_1 = arith.constant 0 : i32
    %c0_i32_2 = arith.constant 0 : i32
    return %c0_i32, %c0_i32_0, %c0_i32_1 : i32, i32, i32
  }
  func.func @transform_3(%arg0: i32) -> (i32, i32, i32) {
    %c0_i32 = arith.constant 0 : i32
    %c0_i32_0 = arith.constant 0 : i32
    %c0_i32_1 = arith.constant 0 : i32
    return %arg0, %c0_i32, %c0_i32_0 : i32, i32, i32
  }
}

</mosaic_0001>

<bundles_post_ra>
// kernel: tpu_custom_call.1
= control target key start
LH: loop header
LB: loop body
LE: loop exit
PB: predicated region body
PF: predicated region fallthrough
CT: control target
= control target key end

     0   :  { %8 = vsyncpa [#allocation3], 0  ;;  %s1751_s12 = smov 0   ;;  %s1934_s0 = inlined_call_operand.vmem [shape: f32[2,3,128], index: 0, kind: input, shape index: {}]   ;;  %s1935_s1 = inlined_call_operand.hbm [shape: f32[12,32,32], index: 1, kind: input, shape index: {}]   ;;  %s1936_s2 = inlined_call_operand.vmem [shape: f32[4,32,1], index: 2, kind: input, shape index: {}]   ;;  %s1937_s3 = inlined_call_operand.vmem [shape: f32[2,3,128], index: 3, kind: output, shape index: {}]  }
   0x1 LB: > { %s1440_s13 = sadd.s32 4294967295, %s1721_s12   ;;  %p1442_p0 = scmp.ge.s32.totalorder %s1721_s12, 1  ;;  %s1721_s12 = sphi %s1751_s12, %s14_s12  }
   0x2   : > { %p113_p1 = scmp.lt.s32.totalorder %s1721_s12, 3  ;;  %s1723_s14 = smov [#allocation2]  }
   0x3   : > { %s125_s15 = sshll.u32 %s1723_s14, 4  ;;  %p1665_p3 = scmp.eq.s32.totalorder %s1440_s13, 0  ;;  %s126_s15 = int_to_ptr.vmem [resolvable:$true] %s125_s15 }
   0x4   : > { %p1759_p2 = pnand %p1442_p0, %p113_p1  ;;  %s1696_s17 = scalar_lea.vmem %s126_s15, 6144 }
   0x5   : > { %p1697_p7 = scmp.ne.s32.totalorder %s126_s15, %s1696_s17  ;;  %p1704_p10 = scmp.lt.s32.totalorder %s126_s15, %s126_s15 }
   0x6   : > { %p1661_p4 = pneg %p1759_p2  ;;  %p1705_p11 = scmp.lt.s32.totalorder %s1696_s17, %s1696_s17 }
   0x8   : > { %p1662_p5 = pnand %p1665_p3, %p1661_p4  ;;  %p1706_p12 = por %p1705_p11, %p1704_p10 }
   0xa   : > { %p1687_p6 = pneg %p1662_p5 }
   0xc   : > { %p1699_p8 = pnand %p1697_p7, %p1687_p6 }
   0xe   : > { %p1700_p9 = pneg %p1699_p8 }
  0x10   : > { %p1707_p13 = pnand %p1706_p12, %p1700_p9 }
  0x12   : > { %1710 = shalt.err (!%p1707_p13)
}
  0x13   : > { %s1724_s18 = smov 128   ;;  %s1725_s19 = smov 8  }
  0x14   : > { %1664 = dma.hbm_to_vmem [thread:$0]  (!%p1662_p5), %s1935_s1, 6144, %s126_s15, [#allocation3], %s1724_s18, %s1724_s18, %s1725_s19  }
  0x15   : > { %151 = sbr.rel (%p1759_p2) target bundleno = 1334 (0x536), region = 32 }
  0x1a   : > { %1716 = dma.done.wait (%p1665_p3), [#allocation3], 6144  }
  0x1b   : > { %1718 = vsyncadd (%p1665_p3), [#allocation3], 4294961152  ;;  %p173_p0 = scmp.lt.s32.totalorder %s1440_s13, 1  ;;  %v1726_v0 = vmov 0   ;;  %vm213_vm0 = vcmask 1042432   ;;  %vm206_vm1 = vcmask 23552   ;;  %v181_v7 = vlaneseq }
  0x1c   : > { %1683 = vset.pattern.permute.xlu1 %v1726_v0  ;;  %1684 = vset.pattern.permute.xlu0 %v1726_v0  ;;  %v186_v2 = vld [vmem:[#allocation2] sm:$0xff]  ;;  %s1727_s26 = smov 1   ;;  %v190_v4 = vld [vmem:[#allocation2 + $0x28] sm:$0xff]  ;;  %s1728_s4 = smov 127   ;;  %vm508_vm4 = vcmask 130048   ;;  %v484_v35 = vld [vmem:[#allocation2 + $0x90] sm:$0xff] }
  0x1d   : > { %s1940_s13 = smov (!%p173_p0, %s1440_s13), 1  ;;  %v189_v3 = vld [vmem:[#allocation2 + $0x20] sm:$0xff]  ;;  %1560 = vmatprep.mubr.msk.f32.mxu0 %vm206_vm1, %v186_v2  ;;  %v195_v5 = vld [vmem:[%s1936_s2 + $0x8] sm:$0xff]  ;;  %v1794_v8 = vand.u32 127, %v181_v7  ;;  %v485_v36 = vld [vmem:[#allocation2 + $0x98] sm:$0xff]  ;;  %vm868_vm5 = vcmask 261120  }
  0x1e   : > { %s1447_s22 = sshll.u32 %s1940_s13, 2  ;;  %1565 = vmatprep.mubr.msk.f32.mxu1 %vm206_vm1, %v189_v3  ;;  %469 = vperm.xlu1 %1683, %v195_v5   ;;  %v194_v6 = vld [vmem:[%s1936_s2] sm:$0xff]  ;;  %v187_v11 = vld [vmem:[#allocation2 + $0x8] sm:$0xff]  ;;  %v1460_v37 = vld [vmem:[%s1936_s2 + $0x30] sm:$0xff]  ;;  %vm1730_vm6 = vmmov 0  }
  0x1f   : > { %s176_s25 = scalar_lea.vmem %s1934_s0, %s1447_s22  ;;  %vm183_vm2 = vcmp.ge.s32.totalorder %v1794_v8, 1  ;;  %vm184_vm3 = vcmp.lt.s32.totalorder %v1794_v8, 15  ;;  %v192_v12 = vld [vmem:[#allocation2 + $0x40] sm:$0xff]  ;;  %v193_v15 = vld [vmem:[#allocation2 + $0x48] sm:$0xff]  ;;  %v1461_v38 = vld [vmem:[%s1936_s2 + $0x38] sm:$0xff]  ;;  %s180_s24 = scalar_lea.vmem %s1937_s3, %s1447_s22 }
  0x20   : > { %v185_v1 = vld [vmem:[%s176_s25] sm:$0x7]  ;;  %v483_v34 = vld [vmem:[#allocation2 + $0x88] sm:$0xff]  ;;  %v479_v44 = vld [vmem:[#allocation2 + $0x70] sm:$0xff] }
  0x21   : > { %196 = vrot.lane.b32.xlu0 %v185_v1, %s1727_s26  ;;  %1563 = vmatprep.subr.msk.mxu1 %vm213_vm0, %v185_v1  ;;  %v477_v18 = vld [vmem:[#allocation2 + $0x60] sm:$0xff]  ;;  %v1459_v39 = vld [vmem:[%s1936_s2 + $0x28] sm:$0xff]  ;;  %v480_v47 = vld [vmem:[#allocation2 + $0x78] sm:$0xff] }
  0x22   : > { %1564 = vmatpush3.msk.msra.mxu1 %vm213_vm0, %v185_v1  ;;  %464 = vperm.xlu1 %1683, %v194_v6   ;;  %v482_v19 = vld [vmem:[#allocation2 + $0x80] sm:$0xff]  ;;  %v478_v43 = vld [vmem:[#allocation2 + $0x68] sm:$0xff]  ;;  %v489_v50 = vld [vmem:[#allocation2 + $0xb0] sm:$0xff] }
  0x23   : > { %1566 = vmatmul.mubr.msk.f32.vlgmr.msra.gmra.mxu1 %vm206_vm1, %v190_v4  ;;  %v1458_v40 = vld [vmem:[%s1936_s2 + $0x20] sm:$0xff]  ;;  %v488_v49 = vld [vmem:[#allocation2 + $0xa8] sm:$0xff]  ;;  %v490_v51 = vld [vmem:[#allocation2 + $0xb8] sm:$0xff] }
  0x24   : > { %1577 = vmatprep.mubr.msk.f32.mxu1 %vm508_vm4, %v477_v18  ;;  %v487_v48 = vld [vmem:[#allocation2 + $0xa0] sm:$0xff] }
  0x25   : > { %201 = vrot.lane.b32.xlu0 %v185_v1, %s1728_s4  ;;  %v833_v4 = vld [vmem:[#allocation2 + $0xc0] sm:$0xff] }
  0x26   : > { %v836_v5 = vld [vmem:[#allocation2 + $0xe0] sm:$0xff] }
  0x93   : > { %v197_v9 = vpop.permute.xlu0 %196 }
  0x94   : > { %v200_v10 = vsel %vm183_vm2, %v197_v9, 0.0 }
  0x95   : > { %1558 = vmatprep.subr.msk.mxu0 %vm213_vm0, %v200_v10 }
  0x96   : > { %1559 = vmatpush3.msk.msra.mxu0 %vm213_vm0, %v200_v10 }
  0x97   : > { %1561 = vmatmul.mubr.msk.f32.vlgmr.msra.gmra.mxu0 %vm206_vm1, %v187_v11  ;;  %v202_v13 = vpop.permute.xlu0 %201 }
  0x98   : > { %v205_v14 = vsel %vm184_vm3, %v202_v13, 0.0  ;;  %1570 = vmatprep.mubr.msk.f32.mxu0 %vm206_vm1, %v192_v12 }
  0x99   : > { %1568 = vmatprep.subr.msk.mxu0 %vm213_vm0, %v205_v14  ;;  %v470_v20 = vpop.permute.xlu1 %469 }
  0x9a   : > { %1569 = vmatpush3.msk.msra.mxu0 %vm213_vm0, %v205_v14 }
  0x9b   : > { %1571 = vmatmul.mubr.msk.f32.vlgmr.msra.gmra.mxu0 %vm206_vm1, %v193_v15 }
  0x9c   : > { %1587 = vmatprep.mubr.msk.f32.mxu0 %vm508_vm4, %v482_v19 }
  0x9d   : > { %v465_v30 = vpop.permute.xlu1 %464 }
  0xe3   : > { %v1567_v16 = vpop.f32.mrf.mxu1 }
  0xe5   : > { %v367_v22 = vpop.f32.mrf.mxu1 }
 0x157   : > { %v1562_v17 = vpop.f32.mrf.mxu0 }
 0x158   : > { %v373_v23 = vadd.f32 %v1567_v16, %v1562_v17 }
 0x159   : > { %v283_v21 = vpop.f32.mrf.mxu0 }
 0x15a   : > { %v368_v25 = vadd.f32 %v367_v22, %v283_v21 }
 0x15b   : > { %v1572_v24 = vpop.f32.mrf.mxu0 }
 0x15c   : > { %v461_v26 = vadd.f32 %v1572_v24, %v373_v23  ;;  %v837_v23 = vld [vmem:[#allocation2 + $0xe8] sm:$0xff] }
 0x15d   : > { %v451_v27 = vpop.f32.mrf.mxu0  ;;  %v1479_v24 = vld [vmem:[%s1936_s2 + $0x48] sm:$0xff] }
 0x15e   : > { %v473_v28 = vadd.f32 %v470_v20, %v461_v26  ;;  %v460_v29 = vadd.f32 %v451_v27, %v368_v25  ;;  %v1478_v25 = vld [vmem:[%s1936_s2 + $0x40] sm:$0xff] }
 0x160   : > { %v475_v31 = vmax.f32 %v473_v28, 0.0  ;;  %v472_v32 = vadd.f32 %v465_v30, %v460_v29  ;;  %v834_v30 = vld [vmem:[#allocation2 + $0xc8] sm:$0xff] }
 0x162   : > { %v474_v33 = vmax.f32 %v472_v32, 0.0  ;;  %498 = vrot.lane.b32.xlu0 %v475_v31, %s1727_s26  ;;  %1583 = vmatprep.subr.mxu0 %v475_v31 }
 0x163   : > { %1584 = vmatpush3.msra.mxu0 %v475_v31 }
 0x164   : > { %496 = vrot.lane.b32.xlu1 %v474_v33, %s1727_s26  ;;  %1585 = vmatprep.subr.mxu0 %v474_v33 }
 0x165   : > { %1586 = vmatpush3.msra.mxu0 %v474_v33 }
 0x166   : > { %504 = vrot.lane.b32.xlu0 %v475_v31, %s1728_s4  ;;  %1588 = vmatmul.mubr.msk.f32.vlgmr.msra.gmra.mxu0 %vm508_vm4, %v483_v34  ;;  %v839_v31 = vld [vmem:[#allocation2 + $0x100] sm:$0xff] }
 0x167   : > { %1590 = vmatprep.mubr.msk.f32.mxu0 %vm508_vm4, %v484_v35 }
 0x168   : > { %502 = vrot.lane.b32.xlu1 %v474_v33, %s1728_s4 }
 0x16a   : > { %1591 = vmatmul.mubr.msk.f32.gmra.mxu0 %vm508_vm4, %v485_v36  ;;  %821 = vperm.xlu0 %1684, %v1461_v38   ;;  %v840_v36 = vld [vmem:[#allocation2 + $0x108] sm:$0xff] }
 0x16b   : > { %1611 = vmatprep.mubr.msk.f32.mxu0 %vm868_vm5, %v833_v4 }
 0x16c   : > { %816 = vperm.xlu1 %1683, %v1460_v37   ;;  %v1729_v37 = vmov 0.0  }
 0x16e   : > { %806 = vperm.xlu0 %1684, %v1458_v40  }
 0x170   : > { %811 = vperm.xlu1 %1683, %v1459_v39  }
 0x1d4   : > { %v499_v41 = vpop.permute.xlu0 %498 }
 0x1d5   : > { %1573 = vmatprep.subr.msk.mxu1 %vm183_vm2, %v499_v41 }
 0x1d6   : > { %1574 = vmatpush3.msk.msra.mxu1 %vm183_vm2, %v499_v41  ;;  %v497_v42 = vpop.permute.xlu1 %496 }
 0x1d7   : > { %1575 = vmatprep.subr.msk.mxu1 %vm183_vm2, %v497_v42 }
 0x1d8   : > { %v505_v45 = vpop.permute.xlu0 %504  ;;  %1576 = vmatpush3.msk.msra.mxu1 %vm183_vm2, %v497_v42 }
 0x1d9   : > { %1578 = vmatmul.mubr.msk.f32.vlgmr.msra.gmra.mxu1 %vm508_vm4, %v478_v43  ;;  %1593 = vmatprep.subr.msk.mxu1 %vm184_vm3, %v505_v45 }
 0x1da   : > { %1594 = vmatpush3.msk.msra.mxu1 %vm184_vm3, %v505_v45  ;;  %v503_v46 = vpop.permute.xlu1 %502  ;;  %1580 = vmatprep.mubr.msk.f32.mxu1 %vm508_vm4, %v479_v44 }
 0x1db   : > { %1595 = vmatprep.subr.msk.mxu1 %vm184_vm3, %v503_v46 }
 0x1dc   : > { %1596 = vmatpush3.msk.msra.mxu1 %vm184_vm3, %v503_v46 }
 0x1dd   : > { %1581 = vmatmul.mubr.msk.f32.gmra.mxu1 %vm508_vm4, %v480_v47 }
 0x1de   : > { %1597 = vmatprep.mubr.msk.f32.mxu1 %vm508_vm4, %v487_v48 }
 0x1e1   : > { %1598 = vmatmul.mubr.msk.f32.vlgmr.msra.gmra.mxu1 %vm508_vm4, %v488_v49 }
 0x1e2   : > { %1600 = vmatprep.mubr.msk.f32.mxu1 %vm508_vm4, %v489_v50 }
 0x1e5   : > { %1601 = vmatmul.mubr.msk.f32.gmra.mxu1 %vm508_vm4, %v490_v51  ;;  %v822_v61 = vpop.permute.xlu0 %821 }
 0x1e6   : > { %1622 = vmatprep.mubr.msk.f32.mxu1 %vm868_vm5, %v836_v5 }
 0x1e7   : > { %v817_v60 = vpop.permute.xlu1 %816 }
 0x1e9   : > { %v807_v15 = vpop.permute.xlu0 %806 }
 0x1eb   : > { %v812_v14 = vpop.permute.xlu1 %811 }
 0x226   : > { %v1589_v52 = vpop.f32.mrf.mxu0 }
 0x228   : > { %v684_v55 = vpop.f32.mrf.mxu0 }
 0x22a   : > { %v1592_v57 = vpop.f32.mrf.mxu0 }
 0x22c   : > { %v694_v62 = vpop.f32.mrf.mxu0 }
 0x299   : > { %v1579_v53 = vpop.f32.mrf.mxu1 }
 0x29a   : > { %v690_v0 = vadd.f32 %v1589_v52, %v1579_v53 }
 0x29b   : > { %v587_v54 = vpop.f32.mrf.mxu1 }
 0x29c   : > { %v685_v2 = vadd.f32 %v684_v55, %v587_v54  ;;  %v1131_v54 = vld [vmem:[#allocation2 + $0x140] sm:$0x7] }
 0x29d   : > { %v1582_v56 = vpop.f32.mrf.mxu1  ;;  %v1494_v55 = vld [vmem:[%s1936_s2 + $0x60] sm:$0x7] }
 0x29e   : > { %v700_v1 = vadd.f32 %v1592_v57, %v1582_v56  ;;  %v1129_v57 = vld [vmem:[#allocation2 + $0x120] sm:$0x7] }
 0x29f   : > { %v597_v58 = vpop.f32.mrf.mxu1 }
 0x2a0   : > { %v695_v6 = vadd.f32 %v694_v62, %v597_v58 }
 0x2a1   : > { %v1599_v59 = vpop.f32.mrf.mxu1 }
 0x2a2   : > { %v801_v7 = vadd.f32 %v1599_v59, %v690_v0 }
 0x2a3   : > { %v781_v63 = vpop.f32.mrf.mxu1 }
 0x2a4   : > { %v800_v11 = vadd.f32 %v781_v63, %v685_v2  ;;  %v825_v16 = vadd.f32 %v812_v14, %v801_v7 }
 0x2a5   : > { %v1602_v3 = vpop.f32.mrf.mxu1 }
 0x2a6   : > { %v803_v9 = vadd.f32 %v1602_v3, %v700_v1  ;;  %v824_v19 = vadd.f32 %v807_v15, %v800_v11  ;;  %v829_v21 = vmax.f32 %v825_v16, 0.0 }
 0x2a7   : > { %v791_v10 = vpop.f32.mrf.mxu1 }
 0x2a8   : > { %v827_v12 = vadd.f32 %v822_v61, %v803_v9  ;;  %v802_v13 = vadd.f32 %v791_v10, %v695_v6  ;;  %v828_v22 = vmax.f32 %v824_v19, 0.0 }
 0x2aa   : > { %v831_v17 = vmax.f32 %v827_v12, 0.0  ;;  %v826_v18 = vadd.f32 %v817_v60, %v802_v13  ;;  %v1133_v60 = vld [vmem:[#allocation2 + $0x160] sm:$0x7] }
 0x2ac   : > { %v830_v20 = vmax.f32 %v826_v18, 0.0  ;;  %850 = vrot.lane.b32.xlu1 %v831_v17, %s1727_s26  ;;  %1614 = vmatprep.subr.mxu1 %v831_v17 }
 0x2ad   : > { %1615 = vmatpush3.msra.mxu1 %v831_v17 }
 0x2ae   : > { %848 = vrot.lane.b32.xlu0 %v830_v20, %s1727_s26  ;;  %1616 = vmatprep.subr.mxu1 %v830_v20 }
 0x2af   : > { %1617 = vmatpush3.msra.mxu1 %v830_v20 }
 0x2b0   : > { %846 = vrot.lane.b32.xlu1 %v829_v21, %s1727_s26  ;;  %1618 = vmatprep.subr.mxu1 %v829_v21 }
 0x2b1   : > { %1619 = vmatpush3.msra.mxu1 %v829_v21 }
 0x2b2   : > { %844 = vrot.lane.b32.xlu0 %v828_v22, %s1727_s26  ;;  %1620 = vmatprep.subr.mxu1 %v828_v22 }
 0x2b3   : > { %1621 = vmatpush3.msra.mxu1 %v828_v22 }
 0x2b4   : > { %862 = vrot.lane.b32.xlu1 %v831_v17, %s1728_s4  ;;  %1623 = vmatmul.mubr.msk.f32.vlgmr.msra.gmra.mxu1 %vm868_vm5, %v837_v23 }
 0x2b5   : > { %1636 = vmatprep.subr.mxu1 %v1729_v37  ;;  %1640 = vmatprep.mubr.msk.f32.mxu1 %vm1730_vm6, %v1729_v37 }
 0x2b6   : > { %860 = vrot.lane.b32.xlu0 %v830_v20, %s1728_s4 }
 0x2b8   : > { %858 = vrot.lane.b32.xlu1 %v829_v21, %s1728_s4 }
 0x2ba   : > { %856 = vrot.lane.b32.xlu0 %v828_v22, %s1728_s4 }
 0x2bc   : > { %1121 = vperm.xlu1 %1683, %v1479_v24  }
 0x2be   : > { %1116 = vperm.xlu0 %1684, %v1478_v25  }
 0x31e   : > { %v851_v26 = vpop.permute.xlu1 %850 }
 0x31f   : > { %1603 = vmatprep.subr.msk.mxu0 %vm183_vm2, %v851_v26 }
 0x320   : > { %1604 = vmatpush3.msk.msra.mxu0 %vm183_vm2, %v851_v26  ;;  %v849_v27 = vpop.permute.xlu0 %848 }
 0x321   : > { %1605 = vmatprep.subr.msk.mxu0 %vm183_vm2, %v849_v27 }
 0x322   : > { %v847_v28 = vpop.permute.xlu1 %846  ;;  %1606 = vmatpush3.msk.msra.mxu0 %vm183_vm2, %v849_v27 }
 0x323   : > { %1607 = vmatprep.subr.msk.mxu0 %vm183_vm2, %v847_v28 }
 0x324   : > { %1608 = vmatpush3.msk.msra.mxu0 %vm183_vm2, %v847_v28  ;;  %v845_v29 = vpop.permute.xlu0 %844 }
 0x325   : > { %1609 = vmatprep.subr.msk.mxu0 %vm183_vm2, %v845_v29 }
 0x326   : > { %v863_v32 = vpop.permute.xlu1 %862  ;;  %1610 = vmatpush3.msk.msra.mxu0 %vm183_vm2, %v845_v29 }
 0x327   : > { %1625 = vmatprep.subr.msk.mxu0 %vm184_vm3, %v863_v32  ;;  %1612 = vmatmul.mubr.msk.f32.vlgmr.msra.gmra.mxu0 %vm868_vm5, %v834_v30 }
 0x328   : > { %1626 = vmatpush3.msk.msra.mxu0 %vm184_vm3, %v863_v32  ;;  %v861_v33 = vpop.permute.xlu0 %860  ;;  %1633 = vmatprep.mubr.msk.f32.mxu0 %vm868_vm5, %v839_v31 }
 0x329   : > { %1627 = vmatprep.subr.msk.mxu0 %vm184_vm3, %v861_v33 }
 0x32a   : > { %v859_v34 = vpop.permute.xlu1 %858  ;;  %1628 = vmatpush3.msk.msra.mxu0 %vm184_vm3, %v861_v33 }
 0x32b   : > { %1629 = vmatprep.subr.msk.mxu0 %vm184_vm3, %v859_v34 }
 0x32c   : > { %1630 = vmatpush3.msk.msra.mxu0 %vm184_vm3, %v859_v34  ;;  %v857_v35 = vpop.permute.xlu0 %856 }
 0x32d   : > { %1631 = vmatprep.subr.msk.mxu0 %vm184_vm3, %v857_v35 }
 0x32e   : > { %1632 = vmatpush3.msk.msra.mxu0 %vm184_vm3, %v857_v35 }
 0x32f   : > { %1634 = vmatmul.mubr.msk.f32.vlgmr.msra.gmra.mxu0 %vm868_vm5, %v840_v36  ;;  %1643 = vmatprep.subr.mxu0 %v1729_v37 }
 0x330   : > { %1647 = vmatprep.mubr.msk.f32.mxu0 %vm1730_vm6, %v1729_v37 }
 0x337   : > { %v1122_v46 = vpop.permute.xlu1 %1121 }
 0x339   : > { %v1117_v50 = vpop.permute.xlu0 %1116 }
 0x374   : > { %v1624_v39 = vpop.f32.mrf.mxu1 }
 0x376   : > { %v1022_v41 = vpop.f32.mrf.mxu1 }
 0x3e7   : > { %v1613_v38 = vpop.f32.mrf.mxu0 }
 0x3e8   : > { %v1028_v42 = vadd.f32 %v1624_v39, %v1613_v38 }
 0x3e9   : > { %v941_v40 = vpop.f32.mrf.mxu0 }
 0x3ea   : > { %v1023_v44 = vadd.f32 %v1022_v41, %v941_v40 }
 0x3ef   : > { %v1635_v43 = vpop.f32.mrf.mxu0 }
 0x3f0   : > { %v1113_v45 = vadd.f32 %v1635_v43, %v1028_v42 }
 0x3f1   : > { %v1103_v47 = vpop.f32.mrf.mxu0 }
 0x3f2   : > { %v1125_v48 = vadd.f32 %v1122_v46, %v1113_v45  ;;  %v1112_v49 = vadd.f32 %v1103_v47, %v1023_v44 }
 0x3f4   : > { %v1127_v51 = vmax.f32 %v1125_v48, 0.0  ;;  %v1124_v52 = vadd.f32 %v1117_v50, %v1112_v49 }
 0x3f6   : > { %v1126_v53 = vmax.f32 %v1124_v52, 0.0  ;;  %1138 = vrot.lane.b32.xlu1 %v1127_v51, %s1727_s26  ;;  %1644 = vmatpush3.msra.mxu0 %v1127_v51 }
 0x3f7   : > { %1645 = vmatprep.subr.mxu0 %v1729_v37 }
 0x3f8   : > { %1136 = vrot.lane.b32.xlu0 %v1126_v53, %s1727_s26  ;;  %1646 = vmatpush3.msra.mxu0 %v1126_v53 }
 0x3f9   : > { %1648 = vmatmul.mubr.msk.f32.vlgmr.msra.gmra.mxu0 %vm508_vm4, %v1131_v54 }
 0x3fa   : > { %1144 = vrot.lane.b32.xlu1 %v1127_v51, %s1728_s4 }
 0x3fc   : > { %1142 = vrot.lane.b32.xlu0 %v1126_v53, %s1728_s4 }
 0x3fe   : > { %1370 = vperm.xlu1 %1683, %v1494_v55  }
 0x468   : > { %v1139_v56 = vpop.permute.xlu1 %1138 }
 0x469   : > { %1637 = vmatpush3.msk.msra.mxu1 %vm183_vm2, %v1139_v56 }
 0x46a   : > { %1638 = vmatprep.subr.mxu1 %v1729_v37  ;;  %v1137_v58 = vpop.permute.xlu0 %1136 }
 0x46b   : > { %1639 = vmatpush3.msk.msra.mxu1 %vm183_vm2, %v1137_v58 }
 0x46c   : > { %v1145_v59 = vpop.permute.xlu1 %1144  ;;  %1641 = vmatmul.mubr.msk.f32.vlgmr.msra.gmra.mxu1 %vm508_vm4, %v1129_v57  ;;  %1650 = vmatprep.subr.mxu1 %v1729_v37 }
 0x46d   : > { %1651 = vmatpush3.msk.msra.mxu1 %vm184_vm3, %v1145_v59  ;;  %1654 = vmatprep.mubr.msk.f32.mxu1 %vm1730_vm6, %v1729_v37 }
 0x46e   : > { %1652 = vmatprep.subr.mxu1 %v1729_v37  ;;  %v1143_v61 = vpop.permute.xlu0 %1142 }
 0x46f   : > { %1653 = vmatpush3.msk.msra.mxu1 %vm184_vm3, %v1143_v61 }
 0x470   : > { %1655 = vmatmul.mubr.msk.f32.vlgmr.msra.gmra.mxu1 %vm508_vm4, %v1133_v60 }
 0x479   : > { %v1371_v5 = vpop.permute.xlu1 %1370 }
 0x4b9   : > { %v1290_v62 = vpop.f32.mrf.mxu0 }
 0x4bb   : > { %v1649_v63 = vpop.f32.mrf.mxu0 }
 0x52c   : > { %v1217_v0 = vpop.f32.mrf.mxu1 }
 0x52d   : > { %v1291_v2 = vadd.f32 %v1290_v62, %v1217_v0 }
 0x52e   : > { %v1642_v1 = vpop.f32.mrf.mxu1 }
 0x530   : > { %v1363_v3 = vpop.f32.mrf.mxu1 }
 0x531   : > { %v1367_v4 = vadd.f32 %v1363_v3, %v1291_v2 }
 0x532   : > { %v1656_v6 = vpop.f32.mrf.mxu1 }
 0x533   : > { %v1373_v7 = vadd.f32 %v1371_v5, %v1367_v4 }
 0x535   : > { %1374 = vst [vmem:[%s180_s24] sm:$0x7] %v1373_v7 }
 0x536 PF: > { %s14_s12 = sadd.s32 1, %s1721_s12  }
 0x537   : > { %p11_p1 = scmp.ge.s32.totalorder %s14_s12, 4  }
 0x539   :  { %13 = sbr.rel (!%p11_p1) target bundleno = 1 (0x1), region = 81 }
 0x53e   :  { %1394 = vsyncpa [#allocation3], 1 }
 0x53f   :  { %1396 = vsyncpa [#allocation3 + $0x1], 1 }

</bundles_post_ra>
